<compile_context>
chip_gen: v5e
topology: v5e:2x2
jax: 0.10.0
libtpu: 0.0.40
codegen_flags: <defaults>
</compile_context>

<pallas_src>
import functools

import numpy as np

import jax
import jax.numpy as jnp
from jax.experimental import pallas as pl
from jax.experimental.pallas import tpu as pltpu


# ----------------------------- fused Pallas kernel -------------------------- #

def _fused_lstm_kernel(graph_ref, gmx_ref, gmh_ref, enc_w_ref, enc_b_ref,
                       w_ref, b_ref, *rest,
                       num_layers, hidden, input_dim, h_init, c_init, has_state):
    f32 = jnp.float32
    bf16 = jnp.bfloat16
    if has_state:
        state_ref, dec_w1_ref, dec_b1_ref, dec_w2_ref, dec_b2_ref, out_ref = rest
    else:
        state_ref = None
        dec_w1_ref, dec_b1_ref, dec_w2_ref, dec_b2_ref, out_ref = rest

    graph = graph_ref[...].astype(f32)
    ntile = graph.shape[0]

    # ---- create_ground_motion_graph: overwrite last 10 feature lanes with gm ----
    lane_x = jax.lax.broadcasted_iota(jnp.int32, (ntile, input_dim), 1)
    x_gm = jnp.where(lane_x >= input_dim - 10, gmx_ref[...], graph)

    # One fused encoder matmul over the row-stacked [x_gm ; graph]:
    #   top half -> X (layer-0 input), bottom half -> HC0 (shared H/C init,
    #   computed ONCE and reused for every layer whose H/C came in as None).
    enc_in = jnp.concatenate([x_gm, graph], axis=0).astype(bf16)
    enc_out = (jnp.dot(enc_in, enc_w_ref[...], preferred_element_type=f32)
               + enc_b_ref[...])
    X = enc_out[:ntile]
    HC0 = enc_out[ntile:]
    # TODO(synk): add jnp.maximum(X, 0) / jnp.maximum(HC0, 0) here if the MLP
    # helper ReLUs its last layer.

    gmh = gmh_ref[...]
    lane_h = jax.lax.broadcasted_iota(jnp.int32, (ntile, hidden), 1)
    gm_mask_h = lane_h >= hidden - 10                         # next_cell_input mask
    lane_g = jax.lax.broadcasted_iota(jnp.int32, (ntile, 4 * hidden), 1)
    g_block = (lane_g >= 2 * hidden) & (lane_g < 3 * hidden)  # tanh block of gates

    h_list, c_list = [], []
    h_prev = None
    for l in range(num_layers):
        if h_init[l]:
            h_l = HC0
        else:
            h_l = state_ref[:, l * hidden:(l + 1) * hidden].astype(f32)
        if c_init[l]:
            c_l = HC0
        else:
            c_l = state_ref[:, (num_layers + l) * hidden:
                               (num_layers + l + 1) * hidden].astype(f32)

        if l == 0:
            inp = X
        else:
            # next_cell_input: H_{l-1} with its last 10 lanes replaced by gm
            inp = jnp.where(gm_mask_h, gmh, h_prev)

        # Single merged gate matmul: [x | h] @ [W_ih ; W_hh] + (b_ih + b_hh)
        xh = jnp.concatenate([inp, h_l], axis=-1).astype(bf16)
        gates = jnp.dot(xh, w_ref[l], preferred_element_type=f32) + b_ref[l]

        # sigmoid(x) = 0.5*(tanh(x/2)+1): ONE full-width tanh on the EUP, then a
        # cheap VPU fixup on the i/f/o lanes.  Gate order i, f, g, o.
        t = jnp.tanh(jnp.where(g_block, gates, 0.5 * gates))
        act = jnp.where(g_block, t, 0.5 * t + 0.5)

        i_g = act[:, 0 * hidden:1 * hidden]
        f_g = act[:, 1 * hidden:2 * hidden]
        g_g = act[:, 2 * hidden:3 * hidden]
        o_g = act[:, 3 * hidden:4 * hidden]

        c_new = f_g * c_l + i_g * g_g
        h_new = o_g * jnp.tanh(c_new)
        h_list.append(h_new)
        c_list.append(c_new)
        h_prev = h_new

    # ---- create_response: single fused (2H,64) matmul on concat([H, C]) ----
    hc = jnp.concatenate([h_list[-1], c_list[-1]], axis=-1).astype(bf16)
    hdec = (jnp.dot(hc, dec_w1_ref[...], preferred_element_type=f32)
            + dec_b1_ref[...])
    hdec = jnp.maximum(hdec, 0.0)
    y = (jnp.dot(hdec.astype(bf16), dec_w2_ref[...], preferred_element_type=f32)
         + dec_b2_ref[...])

    # Lane-dense packed output: [H_0..H_{L-1} | C_0..C_{L-1} | y] in ONE store.
    out_ref[...] = jnp.concatenate(h_list + c_list + [y], axis=-1).astype(out_ref.dtype)


# ----------------------------- wrapper -------------------------------------- #

def _gm_rows(gm, ptr):
    """Per-node (n, 10) matrix of ground-motion values (ptr holds static ints)."""
    bs = len(ptr) - 1
    gm2 = gm.reshape(bs, 10)
    rows = [jnp.broadcast_to(gm2[b], (ptr[b + 1] - ptr[b], 10)) for b in range(bs)]
    return jnp.concatenate(rows, axis=0)


def lstm_forward(params, gm, graph_node, edge_index, edge_attr, ptr,
                 H_list, C_list, num_layers):
    # edge_index / edge_attr are accepted but unused (same as the PyTorch module).
    del edge_index, edge_attr

    n, input_dim = graph_node.shape
    hidden = params["enc_w"].shape[1]
    out_dim = params["dec_w2"].shape[1]
    assert input_dim >= 10 and hidden >= 10
    assert ptr[0] == 0 and ptr[-1] == n

    # Pre-gather gm per node at the LAST 10 lanes of the target width; the kernel
    # blends it in with a lane mask (no per-graph dynamic-update-slices).
    rows = _gm_rows(gm, ptr)
    gm_x = jnp.pad(rows, ((0, 0), (input_dim - 10, 0)))
    gm_h = jnp.pad(rows, ((0, 0), (hidden - 10, 0)))

    # None-ness of H/C is static -> specialize the kernel.  When EVERY state is
    # None (first timestep) the state input is dropped entirely (no zero DMA).
    h_init = tuple(h is None for h in H_list)
    c_init = tuple(c is None for c in C_list)
    has_state = not (all(h_init) and all(c_init))

    state_width = 2 * num_layers * hidden
    out_width = state_width + out_dim

    # Node-tile grid axis ("parallel") so large graphs shard across TCs on v7x.
    # Tiles up to 512 amortize the ~0.35us per-grid-step overhead; for n > 512
    # keep >= 2 grid steps so v7x's second TensorCore gets work.
    node_tile = n if n <= 512 else 512
    assert n % node_tile == 0, "pad n_nodes to a multiple of 512 for large graphs"
    # NOTE: padded rows carry garbage gm/state; callers must mask padded outputs.
    grid = (n // node_tile,)

    row2 = lambda i: (i, 0)
    const2 = lambda i: (0, 0)
    const3 = lambda i: (0, 0, 0)

    inputs = [graph_node, gm_x, gm_h, params["enc_w"], params["enc_b"],
              params["w_all"], params["b_all"]]
    in_specs = [
        pl.BlockSpec((node_tile, input_dim), row2),            # graph_node
        pl.BlockSpec((node_tile, input_dim), row2),            # gm_x
        pl.BlockSpec((node_tile, hidden), row2),               # gm_h
        pl.BlockSpec(params["enc_w"].shape, const2),
        pl.BlockSpec(params["enc_b"].shape, const2),
        pl.BlockSpec(params["w_all"].shape, const3),           # (L, 2H, 4H)
        pl.BlockSpec(params["b_all"].shape, const3),           # (L, 1, 4H)
    ]
    if has_state:
        zeros = jnp.zeros((n, hidden), jnp.float32)
        cols = [H_list[i] if H_list[i] is not None else zeros for i in range(num_layers)]
        cols += [C_list[i] if C_list[i] is not None else zeros for i in range(num_layers)]
        state_in = jnp.concatenate(cols, axis=-1)              # lane-dense (n, 2LH)
        inputs.append(state_in)
        in_specs.append(pl.BlockSpec((node_tile, state_width), row2))
    inputs += [params["dec_w1"], params["dec_b1"], params["dec_w2"], params["dec_b2"]]
    in_specs += [
        pl.BlockSpec(params["dec_w1"].shape, const2),
        pl.BlockSpec(params["dec_b1"].shape, const2),
        pl.BlockSpec(params["dec_w2"].shape, const2),
        pl.BlockSpec(params["dec_b2"].shape, const2),
    ]

    kernel = functools.partial(
        _fused_lstm_kernel, num_layers=num_layers, hidden=hidden,
        input_dim=input_dim, h_init=h_init, c_init=c_init, has_state=has_state)

    out = pl.pallas_call(
        kernel,
        out_shape=jax.ShapeDtypeStruct((n, out_width), jnp.float32),
        grid=grid,
        in_specs=in_specs,
        out_specs=pl.BlockSpec((node_tile, out_width), row2),
        compiler_params=pltpu.CompilerParams(
            dimension_semantics=("parallel",),
            vmem_limit_bytes=32 * 1024 * 1024,   # above v5e's 16 MiB default, safe on v7x
        ),
    )(*inputs)

    H_new = [out[:, i * hidden:(i + 1) * hidden] for i in range(num_layers)]
    C_new = [out[:, (num_layers + i) * hidden:(num_layers + i + 1) * hidden]
             for i in range(num_layers)]
    y = out[:, state_width:]
    return H_new, C_new, y


# ----------------------------- params ---------------------------------------- #

def init_params(key, input_dim, hidden_dim, output_dim, num_layers):
    ks = list(jax.random.split(key, 8 + 2 * num_layers))
    bf16 = jnp.bfloat16

    def u(k, shape, s, dtype=jnp.float32):
        return jax.random.uniform(k, shape, jnp.float32, -s, s).astype(dtype)

    p = {}
    s_enc = 1.0 / float(input_dim) ** 0.5
    p["enc_w"] = u(ks[0], (input_dim, hidden_dim), s_enc, bf16)
    p["enc_b"] = u(ks[1], (1, hidden_dim), s_enc)

    s_l = 1.0 / float(hidden_dim) ** 0.5
    w_all, b_all = [], []
    for i in range(num_layers):
        # rows [0:H] multiply x, rows [H:2H] multiply h  (== [W_ih^T ; W_hh^T])
        w_all.append(u(ks[2 + 2 * i], (2 * hidden_dim, 4 * hidden_dim), s_l, bf16))
        # combined b_ih + b_hh (initialization-only difference vs. PyTorch)
        b_all.append(u(ks[3 + 2 * i], (1, 4 * hidden_dim), 2 * s_l))
    p["w_all"] = jnp.stack(w_all)
    p["b_all"] = jnp.stack(b_all)

    s_d1 = 1.0 / float(2 * hidden_dim) ** 0.5
    p["dec_w1"] = u(ks[2 + 2 * num_layers], (2 * hidden_dim, 64), s_d1, bf16)
    p["dec_b1"] = u(ks[3 + 2 * num_layers], (1, 64), s_d1)
    s_d2 = 1.0 / 8.0
    p["dec_w2"] = u(ks[4 + 2 * num_layers], (64, output_dim), s_d2, bf16)
    p["dec_b2"] = u(ks[5 + 2 * num_layers], (1, output_dim), s_d2)
    return p


# ----------------------------- pure-JAX reference ---------------------------- #

def _ref_forward(params, gm, graph_node, ptr, H_list, C_list, num_layers):
    hi = jax.lax.Precision.HIGHEST
    f32 = jnp.float32
    mm = lambda a, b: jnp.dot(a.astype(f32), b.astype(f32), precision=hi)
    n, input_dim = graph_node.shape
    hidden = params["enc_w"].shape[1]
    rows = _gm_rows(gm, ptr)

    enc = lambda x: mm(x, params["enc_w"]) + params["enc_b"]
    Xg = jnp.concatenate([graph_node[:, :input_dim - 10], rows], axis=1)
    X = enc(Xg)
    HC0 = enc(graph_node)
    Hs = [HC0 if H_list[i] is None else H_list[i] for i in range(num_layers)]
    Cs = [HC0 if C_list[i] is None else C_list[i] for i in range(num_layers)]
    for i in range(num_layers):
        inp = X if i == 0 else jnp.concatenate([Hs[i - 1][:, :hidden - 10], rows], axis=1)
        gates = mm(jnp.concatenate([inp, Hs[i]], axis=1), params["w_all"][i]) + params["b_all"][i]
        ii = jax.nn.sigmoid(gates[:, 0 * hidden:1 * hidden])
        ff = jax.nn.sigmoid(gates[:, 1 * hidden:2 * hidden])
        gg = jnp.tanh(gates[:, 2 * hidden:3 * hidden])
        oo = jax.nn.sigmoid(gates[:, 3 * hidden:4 * hidden])
        c = ff * Cs[i] + ii * gg
        h = oo * jnp.tanh(c)
        Hs[i], Cs[i] = h, c
    state = jnp.concatenate([Hs[-1], Cs[-1]], axis=1)
    hdec = jax.nn.relu(mm(state, params["dec_w1"]) + params["dec_b1"])
    y = mm(hdec, params["dec_w2"]) + params["dec_b2"]
    return Hs, Cs, y


# ----------------------------- main ------------------------------------------ #

if __name__ == "__main__":
    input_dim, hidden_dim, output_dim, num_layers = 16, 32, 4, 2
    batch_size, nodes_per_graph = 2, 8
    n_nodes = batch_size * nodes_per_graph
    ptr = [0, nodes_per_graph, 2 * nodes_per_graph]          # static CSR-style pointer

    key = jax.random.PRNGKey(0)
    k_p, k_gm1, k_gm2, k_graph = jax.random.split(key, 4)

    params = init_params(k_p, input_dim, hidden_dim, output_dim, num_layers)
    gm1 = jax.random.normal(k_gm1, (10 * batch_size,), jnp.float32)
    gm2 = jax.random.normal(k_gm2, (10 * batch_size,), jnp.float32)
    graph_node = jax.random.normal(k_graph, (n_nodes, input_dim), jnp.float32)
    edge_index = jnp.zeros((2, 1), jnp.int32)    # unused by the forward pass
    edge_attr = jnp.zeros((1, 1), jnp.float32)   # unused by the forward pass

    # timestep 1: H/C start as None (set_hidden_state / set_cell_state path)
    H1, C1, y1 = lstm_forward(params, gm1, graph_node, edge_index, edge_attr,
                              ptr, [None] * num_layers, [None] * num_layers, num_layers)
    jax.block_until_ready(y1)

    # timestep 2: feed the state back (recurrent use)
    H2, C2, y2 = lstm_forward(params, gm2, graph_node, edge_index, edge_attr,
                              ptr, H1, C1, num_layers)
    jax.block_until_ready(y2)

    # verify against a pure-JAX reference (same bf16-stored weights, HIGHEST precision)
    Hr1, Cr1, yr1 = _ref_forward(params, gm1, graph_node, ptr,
                                 [None] * num_layers, [None] * num_layers, num_layers)
    Hr2, Cr2, yr2 = _ref_forward(params, gm2, graph_node, ptr, Hr1, Cr1, num_layers)
    np.testing.assert_allclose(np.asarray(y1), np.asarray(yr1), rtol=1e-2, atol=1e-2)
    np.testing.assert_allclose(np.asarray(y2), np.asarray(yr2), rtol=1e-2, atol=1e-2)
    for a, b in zip(H2 + C2, Hr2 + Cr2):
        np.testing.assert_allclose(np.asarray(a), np.asarray(b), rtol=1e-2, atol=1e-2)

    assert y2.shape == (n_nodes, output_dim)
    assert all(h.shape == (n_nodes, hidden_dim) for h in H2)
    assert all(c.shape == (n_nodes, hidden_dim) for c in C2)
    print("KERNEL_OK")
</pallas_src>

<mosaic_0001>
module attributes {stable_mosaic.version = 11 : i64} {
  func.func @_fused_lstm_kernel(%arg0: i32, %arg1: memref<16x16xf32, #tpu.memory_space<vmem>>, %arg2: memref<16x16xf32, #tpu.memory_space<vmem>>, %arg3: memref<16x32xf32, #tpu.memory_space<vmem>>, %arg4: memref<16x32xbf16, #tpu.memory_space<vmem>>, %arg5: memref<1x32xf32, #tpu.memory_space<vmem>>, %arg6: memref<2x64x128xbf16, #tpu.memory_space<vmem>>, %arg7: memref<2x1x128xf32, #tpu.memory_space<vmem>>, %arg8: memref<64x64xbf16, #tpu.memory_space<vmem>>, %arg9: memref<1x64xf32, #tpu.memory_space<vmem>>, %arg10: memref<64x4xbf16, #tpu.memory_space<vmem>>, %arg11: memref<1x4xf32, #tpu.memory_space<vmem>>, %arg12: memref<16x132xf32, #tpu.memory_space<vmem>>) attributes {dimension_semantics = [#tpu.dimension_semantics<parallel>], iteration_bounds = array<i64: 1>, scalar_prefetch = 0 : i64, scratch_operands = 0 : i64, tpu.core_type = #tpu.core_type<tc>, window_params = [{transform_indices = @transform_0, window_bounds = array<i64: 16, 16>}, {transform_indices = @transform_1, window_bounds = array<i64: 16, 16>}, {transform_indices = @transform_2, window_bounds = array<i64: 16, 32>}, {pipeline_mode = #tpu.pipeline_mode<synchronous>, transform_indices = @transform_3, window_bounds = array<i64: 16, 32>}, {pipeline_mode = #tpu.pipeline_mode<synchronous>, transform_indices = @transform_4, window_bounds = array<i64: 1, 32>}, {pipeline_mode = #tpu.pipeline_mode<synchronous>, transform_indices = @transform_5, window_bounds = array<i64: 2, 64, 128>}, {pipeline_mode = #tpu.pipeline_mode<synchronous>, transform_indices = @transform_6, window_bounds = array<i64: 2, 1, 128>}, {pipeline_mode = #tpu.pipeline_mode<synchronous>, transform_indices = @transform_7, window_bounds = array<i64: 64, 64>}, {pipeline_mode = #tpu.pipeline_mode<synchronous>, transform_indices = @transform_8, window_bounds = array<i64: 1, 64>}, {pipeline_mode = #tpu.pipeline_mode<synchronous>, transform_indices = @transform_9, window_bounds = array<i64: 64, 4>}, {pipeline_mode = #tpu.pipeline_mode<synchronous>, transform_indices = @transform_10, window_bounds = array<i64: 1, 4>}, {transform_indices = @transform_11, window_bounds = array<i64: 16, 132>}]} {
    %c0 = arith.constant 0 : index
    %c0_0 = arith.constant 0 : index
    %0 = vector.load %arg1[%c0, %c0_0] : memref<16x16xf32, #tpu.memory_space<vmem>>, vector<16x16xf32>
    %1 = tpu.iota {dimensions = array<i32: 1>} : vector<16x16xi32>
    %c6_i32 = arith.constant 6 : i32
    %2 = vector.broadcast %c6_i32 : i32 to vector<16x16xi32>
    %3 = arith.cmpi sge, %1, %2 : vector<16x16xi32>
    %c0_1 = arith.constant 0 : index
    %c0_2 = arith.constant 0 : index
    %4 = vector.load %arg2[%c0_1, %c0_2] : memref<16x16xf32, #tpu.memory_space<vmem>>, vector<16x16xf32>
    %5 = arith.select %3, %4, %0 : vector<16x16xi1>, vector<16x16xf32>
    %6 = tpu.concatenate %5, %0 in 0 : vector<16x16xf32>, vector<16x16xf32> -> vector<32x16xf32>
    %7 = arith.truncf %6 : vector<32x16xf32> to vector<32x16xbf16>
    %c0_3 = arith.constant 0 : index
    %c0_4 = arith.constant 0 : index
    %8 = vector.load %arg4[%c0_3, %c0_4] : memref<16x32xbf16, #tpu.memory_space<vmem>>, vector<16x32xbf16>
    %cst = arith.constant dense<0.000000e+00> : vector<32x32xf32>
    %9 = tpu.matmul %7, %8, %cst {dimension_numbers = #tpu.dot_dimension_numbers<[1], [0], [0], [1], [0, 0, 1, 1], [], []>} : vector<32x16xbf16>, vector<16x32xbf16>, vector<32x32xf32> -> vector<32x32xf32>
    %c0_5 = arith.constant 0 : index
    %c0_6 = arith.constant 0 : index
    %10 = vector.load %arg5[%c0_5, %c0_6] : memref<1x32xf32, #tpu.memory_space<vmem>>, vector<1x32xf32>
    %11 = vector.broadcast %10 : vector<1x32xf32> to vector<32x32xf32>
    %12 = arith.addf %9, %11 : vector<32x32xf32>
    %13 = vector.extract_strided_slice %12 {offsets = [0, 0], sizes = [16, 32], strides = [1, 1]} : vector<32x32xf32> to vector<16x32xf32>
    %14 = vector.extract_strided_slice %12 {offsets = [16, 0], sizes = [16, 32], strides = [1, 1]} : vector<32x32xf32> to vector<16x32xf32>
    %c0_7 = arith.constant 0 : index
    %c0_8 = arith.constant 0 : index
    %15 = vector.load %arg3[%c0_7, %c0_8] : memref<16x32xf32, #tpu.memory_space<vmem>>, vector<16x32xf32>
    %16 = tpu.iota {dimensions = array<i32: 1>} : vector<16x32xi32>
    %c22_i32 = arith.constant 22 : i32
    %17 = vector.broadcast %c22_i32 : i32 to vector<16x32xi32>
    %18 = arith.cmpi sge, %16, %17 : vector<16x32xi32>
    %19 = tpu.iota {dimensions = array<i32: 1>} : vector<16x128xi32>
    %c64_i32 = arith.constant 64 : i32
    %20 = vector.broadcast %c64_i32 : i32 to vector<16x128xi32>
    %21 = arith.cmpi sge, %19, %20 : vector<16x128xi32>
    %c96_i32 = arith.constant 96 : i32
    %22 = vector.broadcast %c96_i32 : i32 to vector<16x128xi32>
    %23 = arith.cmpi slt, %19, %22 : vector<16x128xi32>
    %24 = arith.andi %21, %23 : vector<16x128xi1>
    %25 = tpu.concatenate %13, %14 in 1 : vector<16x32xf32>, vector<16x32xf32> -> vector<16x64xf32>
    %26 = arith.truncf %25 : vector<16x64xf32> to vector<16x64xbf16>
    %c0_9 = arith.constant 0 : index
    %c0_10 = arith.constant 0 : index
    %c0_11 = arith.constant 0 : index
    %27 = vector.load %arg6[%c0_9, %c0_10, %c0_11] : memref<2x64x128xbf16, #tpu.memory_space<vmem>>, vector<1x64x128xbf16>
    %28 = vector.shape_cast %27 : vector<1x64x128xbf16> to vector<64x128xbf16>
    %cst_12 = arith.constant dense<0.000000e+00> : vector<16x128xf32>
    %29 = tpu.matmul %26, %28, %cst_12 {dimension_numbers = #tpu.dot_dimension_numbers<[1], [0], [0], [1], [0, 0, 1, 1], [], []>} : vector<16x64xbf16>, vector<64x128xbf16>, vector<16x128xf32> -> vector<16x128xf32>
    %c0_13 = arith.constant 0 : index
    %c0_14 = arith.constant 0 : index
    %c0_15 = arith.constant 0 : index
    %30 = vector.load %arg7[%c0_13, %c0_14, %c0_15] : memref<2x1x128xf32, #tpu.memory_space<vmem>>, vector<1x1x128xf32>
    %31 = vector.shape_cast %30 : vector<1x1x128xf32> to vector<1x128xf32>
    %32 = vector.broadcast %31 : vector<1x128xf32> to vector<16x128xf32>
    %33 = arith.addf %29, %32 : vector<16x128xf32>
    %cst_16 = arith.constant 5.000000e-01 : f32
    %34 = vector.broadcast %cst_16 : f32 to vector<16x128xf32>
    %35 = arith.mulf %34, %33 : vector<16x128xf32>
    %36 = arith.select %24, %33, %35 : vector<16x128xi1>, vector<16x128xf32>
    %37 = math.tanh %36 : vector<16x128xf32>
    %cst_17 = arith.constant 5.000000e-01 : f32
    %38 = vector.broadcast %cst_17 : f32 to vector<16x128xf32>
    %39 = arith.mulf %38, %37 : vector<16x128xf32>
    %cst_18 = arith.constant 5.000000e-01 : f32
    %40 = vector.broadcast %cst_18 : f32 to vector<16x128xf32>
    %41 = arith.addf %39, %40 : vector<16x128xf32>
    %42 = arith.select %24, %37, %41 : vector<16x128xi1>, vector<16x128xf32>
    %43 = vector.extract_strided_slice %42 {offsets = [0, 0], sizes = [16, 32], strides = [1, 1]} : vector<16x128xf32> to vector<16x32xf32>
    %44 = vector.extract_strided_slice %42 {offsets = [0, 32], sizes = [16, 32], strides = [1, 1]} : vector<16x128xf32> to vector<16x32xf32>
    %45 = vector.extract_strided_slice %42 {offsets = [0, 64], sizes = [16, 32], strides = [1, 1]} : vector<16x128xf32> to vector<16x32xf32>
    %46 = vector.extract_strided_slice %42 {offsets = [0, 96], sizes = [16, 32], strides = [1, 1]} : vector<16x128xf32> to vector<16x32xf32>
    %47 = arith.mulf %44, %14 : vector<16x32xf32>
    %48 = arith.mulf %43, %45 : vector<16x32xf32>
    %49 = arith.addf %47, %48 : vector<16x32xf32>
    %50 = math.tanh %49 : vector<16x32xf32>
    %51 = arith.mulf %46, %50 : vector<16x32xf32>
    %52 = arith.select %18, %15, %51 : vector<16x32xi1>, vector<16x32xf32>
    %53 = tpu.concatenate %52, %14 in 1 : vector<16x32xf32>, vector<16x32xf32> -> vector<16x64xf32>
    %54 = arith.truncf %53 : vector<16x64xf32> to vector<16x64xbf16>
    %c1 = arith.constant 1 : index
    %c0_19 = arith.constant 0 : index
    %c0_20 = arith.constant 0 : index
    %55 = vector.load %arg6[%c1, %c0_19, %c0_20] : memref<2x64x128xbf16, #tpu.memory_space<vmem>>, vector<1x64x128xbf16>
    %56 = vector.shape_cast %55 : vector<1x64x128xbf16> to vector<64x128xbf16>
    %cst_21 = arith.constant dense<0.000000e+00> : vector<16x128xf32>
    %57 = tpu.matmul %54, %56, %cst_21 {dimension_numbers = #tpu.dot_dimension_numbers<[1], [0], [0], [1], [0, 0, 1, 1], [], []>} : vector<16x64xbf16>, vector<64x128xbf16>, vector<16x128xf32> -> vector<16x128xf32>
    %c1_22 = arith.constant 1 : index
    %c0_23 = arith.constant 0 : index
    %c0_24 = arith.constant 0 : index
    %58 = vector.load %arg7[%c1_22, %c0_23, %c0_24] : memref<2x1x128xf32, #tpu.memory_space<vmem>>, vector<1x1x128xf32>
    %59 = vector.shape_cast %58 : vector<1x1x128xf32> to vector<1x128xf32>
    %60 = vector.broadcast %59 : vector<1x128xf32> to vector<16x128xf32>
    %61 = arith.addf %57, %60 : vector<16x128xf32>
    %cst_25 = arith.constant 5.000000e-01 : f32
    %62 = vector.broadcast %cst_25 : f32 to vector<16x128xf32>
    %63 = arith.mulf %62, %61 : vector<16x128xf32>
    %64 = arith.select %24, %61, %63 : vector<16x128xi1>, vector<16x128xf32>
    %65 = math.tanh %64 : vector<16x128xf32>
    %cst_26 = arith.constant 5.000000e-01 : f32
    %66 = vector.broadcast %cst_26 : f32 to vector<16x128xf32>
    %67 = arith.mulf %66, %65 : vector<16x128xf32>
    %cst_27 = arith.constant 5.000000e-01 : f32
    %68 = vector.broadcast %cst_27 : f32 to vector<16x128xf32>
    %69 = arith.addf %67, %68 : vector<16x128xf32>
    %70 = arith.select %24, %65, %69 : vector<16x128xi1>, vector<16x128xf32>
    %71 = vector.extract_strided_slice %70 {offsets = [0, 0], sizes = [16, 32], strides = [1, 1]} : vector<16x128xf32> to vector<16x32xf32>
    %72 = vector.extract_strided_slice %70 {offsets = [0, 32], sizes = [16, 32], strides = [1, 1]} : vector<16x128xf32> to vector<16x32xf32>
    %73 = vector.extract_strided_slice %70 {offsets = [0, 64], sizes = [16, 32], strides = [1, 1]} : vector<16x128xf32> to vector<16x32xf32>
    %74 = vector.extract_strided_slice %70 {offsets = [0, 96], sizes = [16, 32], strides = [1, 1]} : vector<16x128xf32> to vector<16x32xf32>
    %75 = arith.mulf %72, %14 : vector<16x32xf32>
    %76 = arith.mulf %71, %73 : vector<16x32xf32>
    %77 = arith.addf %75, %76 : vector<16x32xf32>
    %78 = math.tanh %77 : vector<16x32xf32>
    %79 = arith.mulf %74, %78 : vector<16x32xf32>
    %80 = tpu.concatenate %79, %77 in 1 : vector<16x32xf32>, vector<16x32xf32> -> vector<16x64xf32>
    %81 = arith.truncf %80 : vector<16x64xf32> to vector<16x64xbf16>
    %c0_28 = arith.constant 0 : index
    %c0_29 = arith.constant 0 : index
    %82 = vector.load %arg8[%c0_28, %c0_29] : memref<64x64xbf16, #tpu.memory_space<vmem>>, vector<64x64xbf16>
    %cst_30 = arith.constant dense<0.000000e+00> : vector<16x64xf32>
    %83 = tpu.matmul %81, %82, %cst_30 {dimension_numbers = #tpu.dot_dimension_numbers<[1], [0], [0], [1], [0, 0, 1, 1], [], []>} : vector<16x64xbf16>, vector<64x64xbf16>, vector<16x64xf32> -> vector<16x64xf32>
    %c0_31 = arith.constant 0 : index
    %c0_32 = arith.constant 0 : index
    %84 = vector.load %arg9[%c0_31, %c0_32] : memref<1x64xf32, #tpu.memory_space<vmem>>, vector<1x64xf32>
    %85 = vector.broadcast %84 : vector<1x64xf32> to vector<16x64xf32>
    %86 = arith.addf %83, %85 : vector<16x64xf32>
    %cst_33 = arith.constant 0.000000e+00 : f32
    %87 = vector.broadcast %cst_33 : f32 to vector<16x64xf32>
    %88 = arith.maximumf %86, %87 : vector<16x64xf32>
    %89 = arith.truncf %88 : vector<16x64xf32> to vector<16x64xbf16>
    %c0_34 = arith.constant 0 : index
    %c0_35 = arith.constant 0 : index
    %90 = vector.load %arg10[%c0_34, %c0_35] : memref<64x4xbf16, #tpu.memory_space<vmem>>, vector<64x4xbf16>
    %cst_36 = arith.constant dense<0.000000e+00> : vector<16x4xf32>
    %91 = tpu.matmul %89, %90, %cst_36 {dimension_numbers = #tpu.dot_dimension_numbers<[1], [0], [0], [1], [0, 0, 1, 1], [], []>} : vector<16x64xbf16>, vector<64x4xbf16>, vector<16x4xf32> -> vector<16x4xf32>
    %c0_37 = arith.constant 0 : index
    %c0_38 = arith.constant 0 : index
    %92 = vector.load %arg11[%c0_37, %c0_38] : memref<1x4xf32, #tpu.memory_space<vmem>>, vector<1x4xf32>
    %93 = vector.broadcast %92 : vector<1x4xf32> to vector<16x4xf32>
    %94 = arith.addf %91, %93 : vector<16x4xf32>
    %95 = tpu.concatenate %51, %79, %49, %77, %94 in 1 : vector<16x32xf32>, vector<16x32xf32>, vector<16x32xf32>, vector<16x32xf32>, vector<16x4xf32> -> vector<16x132xf32>
    %c0_39 = arith.constant 0 : index
    %c0_40 = arith.constant 0 : index
    %96 = vector.load %arg12[%c0_39, %c0_40] : memref<16x132xf32, #tpu.memory_space<vmem>>, vector<16x132xf32>
    tpu.vector_store %arg12[%c0_39, %c0_40], %95 {strides = array<i32>} : memref<16x132xf32, #tpu.memory_space<vmem>>, vector<16x132xf32>,
    return
  }
  func.func @transform_0(%arg0: i32) -> (i32, i32) {
    %c0_i32 = arith.constant 0 : i32
    %c0_i32_0 = arith.constant 0 : i32
    return %arg0, %c0_i32 : i32, i32
  }
  func.func @transform_1(%arg0: i32) -> (i32, i32) {
    %c0_i32 = arith.constant 0 : i32
    %c0_i32_0 = arith.constant 0 : i32
    return %arg0, %c0_i32 : i32, i32
  }
  func.func @transform_2(%arg0: i32) -> (i32, i32) {
    %c0_i32 = arith.constant 0 : i32
    %c0_i32_0 = arith.constant 0 : i32
    return %arg0, %c0_i32 : i32, i32
  }
  func.func @transform_3(%arg0: i32) -> (i32, i32) {
    %c0_i32 = arith.constant 0 : i32
    %c0_i32_0 = arith.constant 0 : i32
    %c0_i32_1 = arith.constant 0 : i32
    return %c0_i32, %c0_i32_0 : i32, i32
  }
  func.func @transform_4(%arg0: i32) -> (i32, i32) {
    %c0_i32 = arith.constant 0 : i32
    %c0_i32_0 = arith.constant 0 : i32
    %c0_i32_1 = arith.constant 0 : i32
    return %c0_i32, %c0_i32_0 : i32, i32
  }
  func.func @transform_5(%arg0: i32) -> (i32, i32, i32) {
    %c0_i32 = arith.constant 0 : i32
    %c0_i32_0 = arith.constant 0 : i32
    %c0_i32_1 = arith.constant 0 : i32
    %c0_i32_2 = arith.constant 0 : i32
    return %c0_i32, %c0_i32_0, %c0_i32_1 : i32, i32, i32
  }
  func.func @transform_6(%arg0: i32) -> (i32, i32, i32) {
    %c0_i32 = arith.constant 0 : i32
    %c0_i32_0 = arith.constant 0 : i32
    %c0_i32_1 = arith.constant 0 : i32
    %c0_i32_2 = arith.constant 0 : i32
    return %c0_i32, %c0_i32_0, %c0_i32_1 : i32, i32, i32
  }
  func.func @transform_7(%arg0: i32) -> (i32, i32) {
    %c0_i32 = arith.constant 0 : i32
    %c0_i32_0 = arith.constant 0 : i32
    %c0_i32_1 = arith.constant 0 : i32
    return %c0_i32, %c0_i32_0 : i32, i32
  }
  func.func @transform_8(%arg0: i32) -> (i32, i32) {
    %c0_i32 = arith.constant 0 : i32
    %c0_i32_0 = arith.constant 0 : i32
    %c0_i32_1 = arith.constant 0 : i32
    return %c0_i32, %c0_i32_0 : i32, i32
  }
  func.func @transform_9(%arg0: i32) -> (i32, i32) {
    %c0_i32 = arith.constant 0 : i32
    %c0_i32_0 = arith.constant 0 : i32
    %c0_i32_1 = arith.constant 0 : i32
    return %c0_i32, %c0_i32_0 : i32, i32
  }
  func.func @transform_10(%arg0: i32) -> (i32, i32) {
    %c0_i32 = arith.constant 0 : i32
    %c0_i32_0 = arith.constant 0 : i32
    %c0_i32_1 = arith.constant 0 : i32
    return %c0_i32, %c0_i32_0 : i32, i32
  }
  func.func @transform_11(%arg0: i32) -> (i32, i32) {
    %c0_i32 = arith.constant 0 : i32
    %c0_i32_0 = arith.constant 0 : i32
    return %arg0, %c0_i32 : i32, i32
  }
}

</mosaic_0001>

<bundles_post_ra>
// kernel: tpu_custom_call.1
= control target key start
LH: loop header
LB: loop body
LE: loop exit
PB: predicated region body
PF: predicated region fallthrough
CT: control target
= control target key end

     0   :  { %16 = vsyncpa [#allocation3], 0  ;;  %s1082_s0 = inlined_call_operand.hbm [shape: f32[16,16], index: 0, kind: input, shape index: {}]   ;;  %s1083_s1 = inlined_call_operand.hbm [shape: f32[16,16], index: 1, kind: input, shape index: {}]   ;;  %s1084_s2 = inlined_call_operand.hbm [shape: f32[16,32], index: 2, kind: input, shape index: {}]   ;;  %s1085_s3 = inlined_call_operand.hbm [shape: bf16[16,32], index: 3, kind: input, shape index: {}]   ;;  %s1086_s4 = inlined_call_operand.vmem [shape: f32[1,32], index: 4, kind: input, shape index: {}]   ;;  %s1087_s5 = inlined_call_operand.hbm [shape: bf16[2,64,128], index: 5, kind: input, shape index: {}]   ;;  %s1088_s6 = inlined_call_operand.vmem [shape: f32[2,1,128], index: 6, kind: input, shape index: {}]   ;;  %s1089_s7 = inlined_call_operand.vmem [shape: bf16[64,64], index: 7, kind: input, shape index: {}]   ;;  %s1090_s8 = inlined_call_operand.vmem [shape: f32[1,64], index: 8, kind: input, shape index: {}]   ;;  %s1091_s9 = inlined_call_operand.vmem [shape: bf16[64,4], index: 9, kind: input, shape index: {}]   ;;  %s1092_s10 = inlined_call_operand.vmem [shape: f32[1,4], index: 10, kind: input, shape index: {}]   ;;  %s1093_s11 = inlined_call_operand.hbm [shape: f32[16,132], index: 11, kind: output, shape index: {}]  }
   0x1   :  { %17 = vsyncpa [#allocation6], 0 }
   0x2   :  { %18 = vsyncpa [#allocation9], 0 }
   0x3   :  { %19 = vsyncpa [#allocation4], 0  ;;  %s37_s19 = sshll.u32 %s1083_s1, 4  ;;  %s857_s20 = smov [#allocation5]   ;;  %s38_s19 = int_to_ptr.hbm [resolvable:$true] %s37_s19 }
   0x4   :  { %s39_s21 = sshll.u32 %s857_s20, 4  ;;  %s63_s24 = sshll.u32 %s1085_s3, 4  ;;  %s40_s21 = int_to_ptr.vmem [resolvable:$true] %s39_s21  ;;  %s64_s24 = int_to_ptr.hbm [resolvable:$true] %s63_s24 }
   0x5   :  { %s858_s25 = smov 128   ;;  %s859_s26 = smov 8  }
   0x6   :  { %45 = dma.hbm_to_vmem [thread:$0]  %s38_s19, 256, %s40_s21, [#allocation6], %s858_s25, %s858_s25, %s859_s26  }
   0x7   :  { %s860_s27 = smov [#allocation8]   ;;  %s861_s29 = smov 64  }
   0x8   :  { %s65_s28 = sshll.u32 %s860_s27, 4  ;;  %s862_s30 = smov 4   ;;  %s66_s28 = int_to_ptr.vmem [resolvable:$true] %s65_s28 }
   0x9   :  { %71 = dma.hbm_to_vmem [thread:$0]  %s64_s24, 128, %s66_s28, [#allocation9], %s861_s29, %s861_s29, %s862_s30  }
   0xa   :  { %s24_s13 = sshll.u32 %s1082_s0, 4  ;;  %s863_s14 = smov [#allocation2]   ;;  %s25_s13 = int_to_ptr.hbm [resolvable:$true] %s24_s13 }
   0xb   :  { %s26_s15 = sshll.u32 %s863_s14, 4  ;;  %s50_s17 = sshll.u32 %s1084_s2, 4  ;;  %s27_s15 = int_to_ptr.vmem [resolvable:$true] %s26_s15  ;;  %s51_s17 = int_to_ptr.hbm [resolvable:$true] %s50_s17 }
   0xc   :  { %32 = dma.hbm_to_vmem [thread:$0]  %s25_s13, 256, %s27_s15, [#allocation3], %s858_s25, %s858_s25, %s859_s26  }
   0xd   :  { %s864_s18 = smov [#allocation7]   ;;  %s78_s22 = sshll.u32 %s1087_s5, 4  ;;  %s79_s22 = int_to_ptr.hbm [resolvable:$true] %s78_s22 }
   0xe   :  { %s52_s19 = sshll.u32 %s864_s18, 4  ;;  %s865_s0 = smov [#allocation10]   ;;  %s53_s19 = int_to_ptr.vmem [resolvable:$true] %s52_s19 }
   0xf   :  { %58 = dma.hbm_to_vmem [thread:$0]  %s51_s17, 256, %s53_s19, [#allocation6], %s858_s25, %s858_s25, %s859_s26  }
  0x10   :  { %s80_s23 = sshll.u32 %s865_s0, 4  ;;  %s81_s23 = int_to_ptr.vmem [resolvable:$true] %s80_s23 }
  0x11   :  { %86 = dma.hbm_to_vmem [thread:$0]  %s79_s22, 1024, %s81_s23, [#allocation9], %s861_s29, %s861_s29, %s862_s30  }
  0x12   :  { %849 = dma.done.wait [#allocation3], 256  }
  0x13   :  { %850 = vsyncadd [#allocation3], 4294967040 }
  0x14   :  { %851 = dma.done.wait [#allocation6], 512  }
  0x15   :  { %852 = vsyncadd [#allocation6], 4294966784 }
  0x16   :  { %853 = dma.done.wait [#allocation9], 1152  }
  0x17   :  { %854 = vsyncadd [#allocation9], 4294966144  ;;  %v120_v0 = vlaneseq  ;;  %v649_v2 = vld [vmem:[#allocation8] sm:$0xff]  ;;  %v118_v3 = vld [vmem:[#allocation2] sm:$0xff]  ;;  %vm141_vm1 = vcmask 130048   ;;  %s866_s24 = smov 32  }
  0x18   :  { %v119_v4 = vld [vmem:[#allocation2 + $0x8] sm:$0xff]  ;;  %v123_v5 = vld [vmem:[#allocation5] sm:$0xff]  ;;  %v124_v6 = vld [vmem:[#allocation5 + $0x8] sm:$0xff]  ;;  %155 = vmatpush.bf16.msra.mxu0 %v649_v2  ;;  %vm181_vm2 = vcmask 261120   ;;  %vm221_vm3 = vcmask 523264   ;;  %vm545_vm8 = vcmask 785408  }
  0x19   :  { %v949_v1 = vand.u32 127, %v120_v0  ;;  %v128_v10 = vpack.c.bf16 %v119_v4, %v118_v3  ;;  %v653_v11 = vld [vmem:[#allocation10 + $0x18] sm:$0xff]  ;;  %v684_v12 = vld [vmem:[%s1086_s4] ss:$0 sm:$0xff]  ;;  %v652_v21 = vld [vmem:[#allocation10 + $0x10] sm:$0xff]  ;;  %vm549_vm9 = vcmask 31744  }
  0x1a   :  { %229 = vmatpush.bf16.msra.mxu1 %v653_v11  ;;  %v651_v22 = vld [vmem:[#allocation10 + $0x8] sm:$0xff]  ;;  %v650_v23 = vld [vmem:[#allocation10] sm:$0xff]  ;;  %v657_v63 = vld [vmem:[#allocation10 + $0x38] sm:$0xff]  ;;  %s868_s4 = smov 256   ;;  %s869_s25 = smov 16  }
  0x1b   :  { %vm122_vm0 = vcmp.ge.s32.totalorder %v949_v1, 6  ;;  %v685_v29 = vld [vmem:[%s1088_s6] ss:$0 sm:$0xff]  ;;  %vm170_vm4 = vcmp.ge.s32.totalorder %v949_v1, 64  ;;  %vm171_vm5 = vcmp.lt.s32.totalorder %v949_v1, 96  ;;  %343 = vmatpush.bf16.msra.mxu2 %v657_v63  ;;  %v656_v0 = vld [vmem:[#allocation10 + $0x30] sm:$0xff] }
  0x1c   :  { %v125_v7 = vsel %vm122_vm0, %v123_v5, %v118_v3  ;;  %v126_v8 = vsel %vm122_vm0, %v124_v6, %v119_v4  ;;  %vm971_vm6 = vmand %vm170_vm4, %vm171_vm5  ;;  %v655_v2 = vld [vmem:[#allocation10 + $0x28] sm:$0xff]  ;;  %v654_v3 = vld [vmem:[#allocation10 + $0x20] sm:$0xff]  ;;  %vm169_vm7 = vcmp.ge.s32.totalorder %v949_v1, 22 }
  0x1d   :  { %v127_v9 = vpack.c.bf16 %v126_v8, %v125_v7  ;;  %v167_v4 = vld [vmem:[#allocation7] sm:$0xff]  ;;  %v168_v6 = vld [vmem:[#allocation7 + $0x8] sm:$0xff] }
  0x1e   :  { %230 = vmatpush.bf16.msra.mxu1 %v652_v21  ;;  %v686_v1 = vld [vmem:[%s1088_s6 + $0x1] ss:$0 sm:$0xff] }
  0x1f   :  { %578 = vmatmul.msk.bf16.vlgmr.msra.gmra.mxu0 %vm141_vm1, %v127_v9  ;;  %344 = vmatpush.bf16.msra.mxu2 %v656_v0 }
  0x22   :  { %231 = vmatpush.bf16.msra.mxu1 %v651_v22 }
  0x23   :  { %345 = vmatpush.bf16.msra.mxu2 %v655_v2 }
  0x26   :  { %232 = vmatpush.bf16.msra.mxu1 %v650_v23 }
  0x27   :  { %346 = vmatpush.bf16.msra.mxu2 %v654_v3 }
  0x2f   :  { %579 = vmatmul.msk.bf16.gmra.mxu0 %vm141_vm1, %v128_v10 }
  0x9c   :  { %v157_v13 = vpop.f32.mrf.mxu0 }
  0x9d   :  { %v158_v14 = vadd.f32 %v684_v12, %v157_v13 }
  0xa4   :  { %v159_v15 = vpop.f32.mrf.mxu0 }
  0xa5   :  { %v160_v16 = vadd.f32 %v684_v12, %v159_v15 }
  0xac   :  { %v162_v17 = vpop.f32.mrf.mxu0 }
  0xad   :  { %v163_v18 = vadd.f32 %v684_v12, %v162_v17 }
  0xaf   :  { %175 = vrot.lane.b32.xlu0 %v163_v18, %s866_s24 }
  0xb4   :  { %v164_v19 = vpop.f32.mrf.mxu0 }
  0xb5   :  { %v165_v20 = vadd.f32 %v684_v12, %v164_v19 }
  0xb7   :  { %177 = vrot.lane.b32.xlu0 %v165_v20, %s866_s24 }
 0x121   :  { %v957_v24 = vpop.permute.xlu0 %175 }
 0x122   :  { %v182_v26 = vsel %vm181_vm2, %v158_v14, %v957_v24 }
 0x129   :  { %v959_v25 = vpop.permute.xlu0 %177 }
 0x12a   :  { %v183_v27 = vsel %vm181_vm2, %v160_v16, %v959_v25 }
 0x12b   :  { %v184_v28 = vpack.c.bf16 %v183_v27, %v182_v26 }
 0x12d   :  { %596 = vmatmul.msk.bf16.vlgmr.msra.gmra.mxu1 %vm221_vm3, %v184_v28 }
 0x1aa   :  { %v234_v30 = vpop.f32.mrf.mxu1 }
 0x1ab   :  { %v235_v31 = vadd.f32 %v685_v29, %v234_v30 }
 0x1ad   :  { %v239_v33 = vmul.f32 0.5, %v235_v31 }
 0x1af   :  { %v241_v34 = vsel %vm971_vm6, %v235_v31, %v239_v33 }
 0x1b0   :  { %689 = vtanh.f32 %v241_v34 }
 0x1b2   :  { %v236_v35 = vpop.f32.mrf.mxu1 }
 0x1b3   :  { %v237_v36 = vadd.f32 %v685_v29, %v236_v35 }
 0x1b5   :  { %v240_v37 = vmul.f32 0.5, %v237_v36 }
 0x1b6   :  { %v690_v38 = vpop.eup %689 }
 0x1b7   :  { %v242_v39 = vsel %vm971_vm6, %v237_v36, %v240_v37  ;;  %v245_v40 = vmul.f32 0.5, %v690_v38 }
 0x1b8   :  { %691 = vtanh.f32 %v242_v39 }
 0x1b9   :  { %v247_v41 = vadd.f32 0.5, %v245_v40 }
 0x1bb   :  { %v249_v42 = vsel %vm971_vm6, %v690_v38, %v247_v41 }
 0x1bc   :  { %255 = vrot.lane.b32.xlu1 %v249_v42, %s861_s29  ;;  %v251_v51 = vmul.f32 %v249_v42, %v957_v24 }
 0x1be   :  { %v692_v43 = vpop.eup %691 }
 0x1bf   :  { %v246_v44 = vmul.f32 0.5, %v692_v43 }
 0x1c1   :  { %v248_v45 = vadd.f32 0.5, %v246_v44 }
 0x1c3   :  { %v250_v46 = vsel %vm971_vm6, %v692_v43, %v248_v45 }
 0x1c4   :  { %257 = vrot.lane.b32.xlu1 %v250_v46, %s861_s29  ;;  %v252_v54 = vmul.f32 %v250_v46, %v959_v25 }
 0x22e   :  { %v256_v47 = vpop.permute.xlu1 %255 }
 0x22f   :  { %v261_v48 = vmul.f32 %v256_v47, %v249_v42  ;;  %v660_v47 = vld [vmem:[%s1089_s7 + $0x10] sm:$0xff] }
 0x231   :  { %265 = vrot.lane.b32.xlu2 %v261_v48, %s866_s24  ;;  %v659_v48 = vld [vmem:[%s1089_s7 + $0x8] sm:$0xff] }
 0x236   :  { %v258_v49 = vpop.permute.xlu1 %257 }
 0x237   :  { %v262_v50 = vmul.f32 %v258_v49, %v250_v46  ;;  %v658_v49 = vld [vmem:[%s1089_s7] sm:$0xff] }
 0x239   :  { %267 = vrot.lane.b32.xlu2 %v262_v50, %s866_s24  ;;  %v665_v50 = vld [vmem:[%s1091_s9 + $0x18] sm:$0xff] }
 0x23a   :  { %509 = vmatpush.bf16.msrb.mxu1 %v665_v50 }
 0x28b   :  { %v266_v52 = vpop.permute.xlu2 %265 }
 0x28c   :  { %v988_v53 = vadd.f32 %v266_v52, %v251_v51 }
 0x28e   :  { %693 = vtanh.f32 %v988_v53 }
 0x293   :  { %v268_v55 = vpop.permute.xlu2 %267 }
 0x294   :  { %v694_v56 = vpop.eup %693  ;;  %v992_v57 = vadd.f32 %v268_v55, %v252_v54 }
 0x295   :  { %277 = vrot.lane.b32.xlu0 %v694_v56, %s861_s29 }
 0x296   :  { %695 = vtanh.f32 %v992_v57 }
 0x29c   :  { %v696_v58 = vpop.eup %695 }
 0x29d   :  { %279 = vrot.lane.b32.xlu1 %v696_v58, %s861_s29 }
 0x307   :  { %v278_v59 = vpop.permute.xlu0 %277 }
 0x308   :  { %v283_v60 = vmul.f32 %v278_v59, %v249_v42 }
 0x30a   :  { %287 = vrot.lane.b32.xlu2 %v283_v60, %s866_s24 }
 0x30f   :  { %v280_v61 = vpop.permute.xlu1 %279 }
 0x310   :  { %v284_v62 = vmul.f32 %v280_v61, %v250_v46 }
 0x312   :  { %289 = vrot.lane.b32.xlu0 %v284_v62, %s866_s24 }
 0x364   :  { %v1000_v5 = vpop.permute.xlu2 %287 }
 0x365   :  { %v293_v7 = vsel %vm169_vm7, %v167_v4, %v1000_v5 }
 0x366   :  { %v295_v10 = vsel %vm181_vm2, %v293_v7, %v957_v24  ;;  %v664_v7 = vld [vmem:[%s1091_s9 + $0x10] sm:$0xff] }
 0x367   :  { %510 = vmatpush.bf16.msrb.mxu1 %v664_v7 }
 0x384   :  { %v1003_v8 = vpop.permute.xlu0 %289 }
 0x385   :  { %v294_v9 = vsel %vm169_vm7, %v168_v6, %v1003_v8 }
 0x386   :  { %v296_v11 = vsel %vm181_vm2, %v294_v9, %v959_v25 }
 0x387   :  { %v297_v12 = vpack.c.bf16 %v296_v11, %v295_v10  ;;  %v687_v10 = vld [vmem:[%s1090_s8] ss:$0 sm:$0xff] }
 0x389   :  { %614 = vmatmul.msk.bf16.vlgmr.msra.gmra.mxu2 %vm221_vm3, %v297_v12 }
 0x40c   :  { %v348_v13 = vpop.f32.mrf.mxu2 }
 0x40d   :  { %v349_v14 = vadd.f32 %v686_v1, %v348_v13 }
 0x40f   :  { %v353_v15 = vmul.f32 0.5, %v349_v14 }
 0x411   :  { %v355_v16 = vsel %vm971_vm6, %v349_v14, %v353_v15 }
 0x412   :  { %697 = vtanh.f32 %v355_v16  ;;  %v688_v16 = vld [vmem:[%s1092_s10] ss:$0 sm:$0xff] }
 0x414   :  { %v350_v17 = vpop.f32.mrf.mxu2 }
 0x415   :  { %v351_v18 = vadd.f32 %v686_v1, %v350_v17 }
 0x417   :  { %v354_v19 = vmul.f32 0.5, %v351_v18 }
 0x418   :  { %v698_v20 = vpop.eup %697 }
 0x419   :  { %v356_v21 = vsel %vm971_vm6, %v351_v18, %v354_v19  ;;  %v359_v22 = vmul.f32 0.5, %v698_v20 }
 0x41a   :  { %699 = vtanh.f32 %v356_v21 }
 0x41b   :  { %v361_v23 = vadd.f32 0.5, %v359_v22 }
 0x41d   :  { %v363_v26 = vsel %vm971_vm6, %v698_v20, %v361_v23 }
 0x41e   :  { %369 = vrot.lane.b32.xlu1 %v363_v26, %s861_s29  ;;  %v365_v32 = vmul.f32 %v363_v26, %v957_v24  ;;  %v661_v24 = vld [vmem:[%s1089_s7 + $0x18] sm:$0xff] }
 0x41f   :  { %453 = vmatpush.bf16.msra.mxu3 %v661_v24 }
 0x420   :  { %v700_v27 = vpop.eup %699 }
 0x421   :  { %v360_v28 = vmul.f32 0.5, %v700_v27 }
 0x423   :  { %v362_v29 = vadd.f32 0.5, %v360_v28  ;;  %454 = vmatpush.bf16.msra.mxu3 %v660_v47 }
 0x425   :  { %v364_v30 = vsel %vm971_vm6, %v700_v27, %v362_v29 }
 0x426   :  { %371 = vrot.lane.b32.xlu2 %v364_v30, %s861_s29  ;;  %v366_v36 = vmul.f32 %v364_v30, %v959_v25 }
 0x427   :  { %455 = vmatpush.bf16.msra.mxu3 %v659_v48 }
 0x42b   :  { %456 = vmatpush.bf16.msra.mxu3 %v658_v49 }
 0x480   :  { %v372_v31 = vpop.permute.xlu2 %371 }
 0x481   :  { %v376_v33 = vmul.f32 %v372_v31, %v364_v30 }
 0x483   :  { %381 = vrot.lane.b32.xlu1 %v376_v33, %s866_s24 }
 0x490   :  { %v370_v34 = vpop.permute.xlu1 %369 }
 0x491   :  { %v375_v35 = vmul.f32 %v370_v34, %v363_v26 }
 0x493   :  { %379 = vrot.lane.b32.xlu0 %v375_v35, %s866_s24 }
 0x4f5   :  { %v382_v37 = vpop.permute.xlu1 %381 }
 0x4f6   :  { %v386_v38 = vadd.f32 %v382_v37, %v366_v36 }
 0x4f8   :  { %701 = vtanh.f32 %v386_v38 }
 0x4fe   :  { %v702_v39 = vpop.eup %701 }
 0x4ff   :  { %393 = vrot.lane.b32.xlu0 %v702_v39, %s861_s29 }
 0x505   :  { %v380_v40 = vpop.permute.xlu0 %379 }
 0x506   :  { %v385_v41 = vadd.f32 %v380_v40, %v365_v32 }
 0x508   :  { %703 = vtanh.f32 %v385_v41 }
 0x50e   :  { %v704_v42 = vpop.eup %703 }
 0x50f   :  { %391 = vrot.lane.b32.xlu2 %v704_v42, %s861_s29 }
 0x569   :  { %v392_v43 = vpop.permute.xlu2 %391 }
 0x56a   :  { %v397_v44 = vmul.f32 %v392_v43, %v363_v26 }
 0x56c   :  { %519 = vrot.lane.b32.xlu2 %v397_v44, %s861_s29 }
 0x571   :  { %v394_v45 = vpop.permute.xlu0 %393 }
 0x572   :  { %v398_v25 = vmul.f32 %v394_v45, %v364_v30 }
 0x574   :  { %v679_v46 = vpack.i.bf16 %v398_v25, %v397_v44  ;;  %521 = vrot.lane.b32.xlu0 %v398_v25, %s861_s29  ;;  %529 = vrot.lane.b32.xlu2 %v992_v57, %s866_s24 }
 0x576   :  { %680 = vrot.lane.b32.xlu1 %v679_v46, %s866_s24 }
 0x57c   :  { %535 = vrot.lane.b32.xlu0 %v385_v41, %s861_s29 }
 0x57e   :  { %527 = vrot.lane.b32.xlu1 %v988_v53, %s866_s24  ;;  %s559_s24 = sshll.u32 %s1093_s11, 4  ;;  %s560_s24 = int_to_ptr.hbm [resolvable:$true] %s559_s24 }
 0x586   :  { %537 = vrot.lane.b32.xlu1 %v386_v38, %s861_s29 }
 0x5c6   :  { %v520_v58 = vpop.permute.xlu2 %519 }
 0x5c7   :  { %v541_v59 = vsel %vm181_vm2, %v1000_v5, %v520_v58  ;;  %v663_v5 = vld [vmem:[%s1091_s9 + $0x8] sm:$0xff] }
 0x5c8   :  { %511 = vmatpush.bf16.msrb.mxu1 %v663_v5 }
 0x5ce   :  { %v530_v2 = vpop.permute.xlu2 %529 }
 0x5e6   :  { %v522_v51 = vpop.permute.xlu0 %521 }
 0x5e7   :  { %v542_v0 = vsel %vm181_vm2, %v1003_v8, %v522_v51  ;;  %v662_v8 = vld [vmem:[%s1091_s9] sm:$0xff]  ;;  %s867_s9 = smov [#allocation11]  }
 0x5e8   :  { %v681_v52 = vpop.permute.xlu1 %680  ;;  %v544_v3 = vsel %vm221_vm3, %v542_v0, %v530_v2  ;;  %512 = vmatpush.bf16.msrb.mxu1 %v662_v8  ;;  %s557_s2 = sshll.u32 %s867_s9, 4  ;;  %s558_s2 = int_to_ptr.vmem [resolvable:$true] %s557_s2 }
 0x5e9   :  { %v683_v53 = vunpack.i.h.bf16 %v681_v52  ;;  %v682_v54 = vunpack.i.l.bf16 %v681_v52 }
 0x5eb   :  { %v407_v55 = vsel %vm181_vm2, %v682_v54, %v385_v41  ;;  %v408_v56 = vsel %vm181_vm2, %v683_v53, %v386_v38 }
 0x5ec   :  { %v409_v57 = vpack.c.bf16 %v408_v56, %v407_v55 }
 0x5ee   :  { %631 = vmatmul.msk.bf16.vlgmr.msra.gmra.mxu3 %vm221_vm3, %v409_v57  ;;  %v536_v61 = vpop.permute.xlu0 %535 }
 0x5f0   :  { %v528_v60 = vpop.permute.xlu1 %527 }
 0x5f1   :  { %v543_v62 = vsel %vm221_vm3, %v541_v59, %v528_v60 }
 0x5f2   :  { %v546_v63 = vsel %vm545_vm8, %v543_v62, %v536_v61 }
 0x5f3   :  { %548 = vst [vmem:[#allocation11] sm:$0xff] %v546_v63 }
 0x5f8   :  { %v538_v4 = vpop.permute.xlu1 %537 }
 0x5f9   :  { %v547_v6 = vsel %vm545_vm8, %v544_v3, %v538_v4 }
 0x5fa   :  { %551 = vst [vmem:[#allocation11 + $0x10] sm:$0xff] %v547_v6 }
 0x671   :  { %v458_v9 = vpop.f32.mrf.mxu3 }
 0x672   :  { %v459_v11 = vadd.f32 %v687_v10, %v458_v9 }
 0x674   :  { %v463_v13 = vmax.f32 %v459_v11, 0.0 }
 0x679   :  { %v460_v12 = vpop.f32.mrf.mxu3 }
 0x67a   :  { %v461_v1 = vadd.f32 %v687_v10, %v460_v12 }
 0x67c   :  { %v464_v14 = vmax.f32 %v461_v1, 0.0 }
 0x67e   :  { %v465_v15 = vpack.c.bf16 %v464_v14, %v463_v13 }
 0x680   :  { %648 = vmatmul.msk.bf16.vlgmr.msrb.gmra.mxu1 %vm221_vm3, %v465_v15 }
 0x6fd   :  { %v514_v17 = vpop.f32.mrf.mxu1 }
 0x6fe   :  { %v515_v18 = vadd.f32 %v688_v16, %v514_v17 }
 0x700   :  { %550 = vst.msk [vmem:[#allocation11 + $0x8] sm:$0xff] %vm549_vm9, %v515_v18 }
 0x705   :  { %v516_v19 = vpop.f32.mrf.mxu1 }
 0x706   :  { %v517_v20 = vadd.f32 %v688_v16, %v516_v19 }
 0x708   :  { %552 = vst.msk [vmem:[#allocation11 + $0x18] sm:$0xff] %vm549_vm9, %v517_v20 }
 0x709   :  { %565 = dma.vmem_to_hbm [thread:$0]  %s558_s2, 512, %s560_s24, [#allocation4], %s868_s4, %s868_s4, %s869_s25  }
 0x70a   :  { %855 = dma.done.wait [#allocation4], 512  }
 0x70b   :  { %856 = vsyncadd [#allocation4], 4294966784 }
 0x70c   :  { %570 = vsyncpa [#allocation3], 1 }
 0x70d   :  { %571 = vsyncpa [#allocation6], 1 }
 0x70e   :  { %572 = vsyncpa [#allocation9], 1 }
 0x70f   :  { %573 = vsyncpa [#allocation4], 1 }

</bundles_post_ra>
